<compile_context>
chip_gen: v5e
topology: v5e:2x2
jax: 0.10.0
libtpu: 0.0.40
codegen_flags: <defaults>
</compile_context>

<pallas_src>
import math

import numpy as np
import jax
import jax.numpy as jnp
from jax.experimental import pallas as pl
from jax.experimental.pallas import tpu as pltpu


# --------------- static tree helpers (mirror the PyTorch module) ---------------
def get_children(target_parent_idx, parent_indexes):
    return [i for i, p in enumerate(parent_indexes) if p == target_parent_idx]


def get_path_from_root(idx, parent_indexes):
    if idx != 0:
        return get_path_from_root(parent_indexes[idx], parent_indexes) + [idx]
    return []


def get_nb_nn_outputs(children_list):
    n = 0
    for node in children_list:
        if len(node) == 2:
            n += 1
        elif len(node) >= 3:
            n += len(node)
    return n


class HierarchicalLossConvexSpec:
    """Precomputes the static (tree-dependent) matrices consumed by the kernel."""

    def __init__(self, parent_list):
        self.parent_list = parent_list
        H = len(parent_list)
        self.nb_h_classes = H
        self.childrens_list = [get_children(i, parent_list) for i in range(H)]
        self.paths_from_root = [get_path_from_root(i, parent_list) for i in range(H)]
        self.depths = [len(p) + 1 for p in self.paths_from_root]
        self.nb_of_nn_outputs = get_nb_nn_outputs(self.childrens_list)
        self.leafs = [i for i, c in enumerate(self.childrens_list) if len(c) == 0]
        self.n_classes = len(self.leafs)

        # S: scatter nn outputs -> per-class logits
        S = np.zeros((self.nb_of_nn_outputs, H), np.float32)
        start = 0
        for parent_idx, children in enumerate(self.childrens_list):
            if len(children) == 2:
                S[start, children[0]] = 1.0
                start += 1
            elif len(children) >= 3:
                for j, c in enumerate(children):
                    S[start + j, c] = 1.0
                start += len(children)
        self.S = S

        # G: sibling-group membership (softmax denominator scatter)
        G = np.zeros((H, H), np.float32)
        for children in self.childrens_list:
            for a in children:
                for b in children:
                    G[a, b] = 1.0
        G[0, 0] = 1.0  # root: p -> 1, weight 0 in W, contributes nothing
        self.G = G

        # W: 1/depth-weighted binary hierarchical label per leaf class
        W = np.zeros((self.n_classes, H), np.float32)
        for label, leaf_idx in enumerate(self.leafs):
            cur = leaf_idx
            while cur != 0:
                W[label, cur] = 1.0 / self.depths[parent_list[cur]]
                cur = parent_list[cur]
        self.W = W

        # M: sibling-group masks (every class belongs to exactly one group;
        # the root gets its own singleton group) -> per-group max stabilization
        self.groups = [c for c in self.childrens_list if c] + [[0]]
        M = np.zeros((H, len(self.groups)), np.float32)
        for gi, grp in enumerate(self.groups):
            for c in grp:
                M[c, gi] = 1.0
        self.M = M


_LOG_LO = float(math.log(1e-9))       # log(1e-9)    lower clamp of torch.clamp
_LOG_HI = float(math.log1p(-1e-9))    # log(1-1e-9)  upper clamp of torch.clamp
_NEG_BIG = -1e30                      # "minus infinity" for masked maxes


def _round_up(x, m):
    return (x + m - 1) // m * m


def _pick_batch_tile(B, block_b):
    """Batch tile: multiple of 128, large (amortize ~0.35us/step grid overhead),
    but >= 2 tiles when the batch allows it so the 'parallel' grid axis can be
    sharded across v7x's two TensorCores."""
    b128 = _round_up(B, 128)
    if b128 <= 256:
        return b128
    return max(128, min(_round_up(block_b, 128), _round_up((B + 1) // 2, 128)))


def hierarchical_loss_convex(spec, inputs, targets, block_b=16384):
    """Mean hierarchical convex loss == HierarchicalLossConvex.forward(inputs, targets)."""
    inputs = jnp.asarray(inputs)
    if inputs.ndim != 2 or inputs.shape[1] != spec.nb_of_nn_outputs:
        raise ValueError(
            "The number of outputs from the model is incorrect to compute the "
            "loss given the hierarchical configuration you provided.")
    if inputs.dtype not in (jnp.float32, jnp.bfloat16):
        inputs = inputs.astype(jnp.float32)
    targets = jnp.asarray(targets, jnp.int32)

    B, n_out = inputs.shape
    H = spec.nb_h_classes
    n_classes = spec.n_classes
    n_groups = len(spec.groups)

    tb = _pick_batch_tile(B, block_b)
    b_pad = _round_up(B, tb)
    grid_b = b_pad // tb

    # Pad only when the batch is not tile-aligned (aligned batches stream
    # straight from HBM with no extra pass).  Padded lanes are masked in-kernel.
    if b_pad != B:
        inputs = jnp.pad(inputs, ((0, b_pad - B), (0, 0)))
        targets = jnp.pad(targets, (0, b_pad - B))
    targets2d = targets.reshape(1, b_pad)

    # tiny resident constants (constant index_map => fetched once, no re-DMA)
    st = jnp.asarray(spec.S.T, dtype=inputs.dtype)    # (H, n_out)
    g = jnp.asarray(spec.G, dtype=jnp.float32)        # (H, H)
    wt = jnp.asarray(spec.W.T, dtype=jnp.float32)     # (H, n_classes)
    gm = jnp.asarray(spec.M, dtype=jnp.float32)       # (H, n_groups)

    def kernel(x_ref, tgt_ref, st_ref, g_ref, wt_ref, gm_ref, out_ref):
        # z = S^T x^T : NT matmul, the MXU eats the transpose of the natural
        # (tb, n_out) tile; result is batch-on-lanes (H, tb), lane-dense.
        z = jax.lax.dot_general(
            st_ref[...], x_ref[...],
            dimension_numbers=(((1,), (1,)), ((), ())),
            preferred_element_type=jnp.float32)                      # (H, tb)

        # Per-sibling-group max subtraction (exact; groups are static, so this
        # is a short unrolled loop of masked maxes).  A global max would couple
        # groups and can underflow a group's denominator when logit ranges
        # across groups differ by ~87+.
        m_cols = gm_ref[...]                                         # (H, n_groups)
        gmax = jnp.zeros_like(z)
        for gi in range(n_groups):
            col = m_cols[:, gi:gi + 1]                               # (H, 1)
            m_g = jnp.max(jnp.where(col > 0, z, _NEG_BIG),
                          axis=0, keepdims=True)                     # (1, tb)
            gmax = gmax + col * m_g
        z = z - gmax                                                 # <= 0

        u = jnp.exp(z)                                               # (H, tb), <= 1
        denom = jnp.dot(g_ref[...], u,
                        preferred_element_type=jnp.float32)          # (H, tb), >= 1
        # log-softmax per sibling group; clamping in log space == log(clamp(p))
        logp = jnp.clip(z - jnp.log(denom), _LOG_LO, _LOG_HI)

        # qw = W^T @ onehot(targets): 1/depth-weighted binary hierarchical label
        cls = jax.lax.broadcasted_iota(jnp.int32, (n_classes, tb), 0)
        onehot = (cls == tgt_ref[...]).astype(jnp.float32)
        qw = jnp.dot(wt_ref[...], onehot,
                     preferred_element_type=jnp.float32)             # (H, tb)

        # mask padded lanes (global sample index >= B) and reduce in-kernel
        lane = jax.lax.broadcasted_iota(jnp.int32, (1, tb), 1)
        valid = ((pl.program_id(0) * tb + lane) < B).astype(jnp.float32)
        partial = -jnp.sum(qw * valid * logp, keepdims=True)         # (1, 1)
        out_ref[...] = jnp.broadcast_to(partial.reshape(1, 1, 1), out_ref.shape)

    # VMEM budget: double-buffered natural-layout x tile is lane-padded
    # (n_out -> 128 lanes), plus ~a dozen (H -> 16, tb) f32 temporaries.
    # Stay well under v7x's 64 MiB physical VMEM.
    est_vmem = tb * (2 * 128 * 4 + 2 * 8 * 4 + 12 * 16 * 4) + (4 << 20)
    vmem_limit = int(min(max(est_vmem, 32 << 20), 56 << 20))

    partials = pl.pallas_call(
        kernel,
        out_shape=jax.ShapeDtypeStruct((grid_b, 8, 128), jnp.float32),
        grid=(grid_b,),
        in_specs=[
            pl.BlockSpec((tb, n_out), lambda i: (i, 0)),        # streamed x tile
            pl.BlockSpec((1, tb), lambda i: (0, i)),            # streamed targets
            pl.BlockSpec((H, n_out), lambda i: (0, 0)),         # S^T   (resident)
            pl.BlockSpec((H, H), lambda i: (0, 0)),             # G     (resident)
            pl.BlockSpec((H, n_classes), lambda i: (0, 0)),     # W^T   (resident)
            pl.BlockSpec((H, n_groups), lambda i: (0, 0)),      # group masks
        ],
        out_specs=pl.BlockSpec((1, 8, 128), lambda i: (i, 0, 0)),  # per-tile partial
        compiler_params=pltpu.CompilerParams(
            dimension_semantics=("parallel",),
            vmem_limit_bytes=vmem_limit),
    )(inputs, targets2d, st, g, wt, gm)

    # mean over the valid (un-padded) samples; partials already exclude padding
    return jnp.sum(partials[:, 0, 0]) / B


# ----- pure-numpy reference mirroring the PyTorch forward exactly -----
def reference_loss(spec, inputs, targets):
    inputs = np.asarray(inputs, np.float64)
    B = inputs.shape[0]
    H = spec.nb_h_classes
    losses = np.zeros(B)
    for i in range(B):
        probas = np.zeros((H, H))
        start = 0
        for parent_idx, children in enumerate(spec.childrens_list):
            if children:
                n = len(children)
                if n == 2:
                    u = np.exp(inputs[i, start])
                    probas[parent_idx, children[0]] = u / (1 + u)
                    probas[parent_idx, children[1]] = 1 - u / (1 + u)
                    start += 1
                else:
                    u = np.exp(inputs[i, start:start + n])
                    probas[parent_idx, children] = u / u.sum()
                    start += n
        probas = np.clip(probas, 1e-9, 1 - 1e-9)
        bl = np.zeros(H)
        cur = spec.leafs[int(targets[i])]
        while cur != 0:
            bl[cur] = 1.0
            cur = spec.parent_list[cur]
        loss = 0.0
        for parent_idx, children in enumerate(spec.childrens_list):
            if children:
                p = probas[parent_idx, children]
                q = bl[children]
                kl = np.sum(np.where(q > 0,
                                     q * (np.log(np.maximum(q, 1e-30)) - np.log(p)),
                                     0.0))
                loss += kl / spec.depths[parent_idx]
        losses[i] = loss
    return losses.mean()


if __name__ == "__main__":
    # Tree: root 0 -> {1,2,3}; node 1 -> {4,5} (sigmoid branch);
    # node 2 -> {6,7,8} (softmax branch).  -> 9 h-classes, 7 nn outputs, 6 leaves.
    parent_list = [None, 0, 0, 0, 1, 1, 2, 2, 2]
    spec = HierarchicalLossConvexSpec(parent_list)

    key = jax.random.PRNGKey(0)
    k1, k2, k3, k4, k5, k6 = jax.random.split(key, 6)

    # case 1: tiny batch, single tile, heavy lane masking of the padded lanes
    b1 = 8
    x1 = jax.random.normal(k1, (b1, spec.nb_of_nn_outputs), dtype=jnp.float32)
    t1 = jax.random.randint(k2, (b1,), 0, spec.n_classes)
    l1 = jax.block_until_ready(hierarchical_loss_convex(spec, x1, t1))
    r1 = reference_loss(spec, np.asarray(x1), np.asarray(t1))
    assert np.allclose(float(l1), r1, rtol=5e-4, atol=1e-5), (float(l1), r1)

    # case 2: multi-tile grid (3 x 128) + batch padding + wide logit range
    #         (exercises the per-group max stabilization and the log clamps)
    b2 = 300
    x2 = 10.0 * jax.random.normal(k3, (b2, spec.nb_of_nn_outputs), dtype=jnp.float32)
    t2 = jax.random.randint(k4, (b2,), 0, spec.n_classes)
    l2 = jax.block_until_ready(hierarchical_loss_convex(spec, x2, t2, block_b=128))
    r2 = reference_loss(spec, np.asarray(x2), np.asarray(t2))
    assert np.allclose(float(l2), r2, rtol=5e-4, atol=1e-5), (float(l2), r2)

    # case 3: default (large-tile) path -> 2 tiles, keeps the 'parallel' axis
    #         splittable across v7x's two TensorCores
    b3 = 1000
    x3 = jax.random.normal(k5, (b3, spec.nb_of_nn_outputs), dtype=jnp.float32)
    t3 = jax.random.randint(k6, (b3,), 0, spec.n_classes)
    l3 = jax.block_until_ready(hierarchical_loss_convex(spec, x3, t3))
    r3 = reference_loss(spec, np.asarray(x3), np.asarray(t3))
    assert np.allclose(float(l3), r3, rtol=5e-4, atol=1e-5), (float(l3), r3)

    print("KERNEL_OK")
</pallas_src>

<mosaic_0001>
module attributes {stable_mosaic.version = 11 : i64} {
  func.func @kernel(%arg0: i32, %arg1: memref<128x7xf32, #tpu.memory_space<vmem>>, %arg2: memref<1x128xi32, #tpu.memory_space<vmem>>, %arg3: memref<9x7xf32, #tpu.memory_space<vmem>>, %arg4: memref<9x9xf32, #tpu.memory_space<vmem>>, %arg5: memref<9x6xf32, #tpu.memory_space<vmem>>, %arg6: memref<9x4xf32, #tpu.memory_space<vmem>>, %arg7: memref<1x8x128xf32, #tpu.memory_space<vmem>>) attributes {dimension_semantics = [#tpu.dimension_semantics<parallel>], iteration_bounds = array<i64: 1>, scalar_prefetch = 0 : i64, scratch_operands = 0 : i64, tpu.core_type = #tpu.core_type<tc>, window_params = [{transform_indices = @transform_0, window_bounds = array<i64: 128, 7>}, {transform_indices = @transform_1, window_bounds = array<i64: 1, 128>}, {pipeline_mode = #tpu.pipeline_mode<synchronous>, transform_indices = @transform_2, window_bounds = array<i64: 9, 7>}, {pipeline_mode = #tpu.pipeline_mode<synchronous>, transform_indices = @transform_3, window_bounds = array<i64: 9, 9>}, {pipeline_mode = #tpu.pipeline_mode<synchronous>, transform_indices = @transform_4, window_bounds = array<i64: 9, 6>}, {pipeline_mode = #tpu.pipeline_mode<synchronous>, transform_indices = @transform_5, window_bounds = array<i64: 9, 4>}, {transform_indices = @transform_6, window_bounds = array<i64: 1, 8, 128>}]} {
    %c0 = arith.constant 0 : index
    %c0_0 = arith.constant 0 : index
    %0 = vector.load %arg3[%c0, %c0_0] : memref<9x7xf32, #tpu.memory_space<vmem>>, vector<9x7xf32>
    %c0_1 = arith.constant 0 : index
    %c0_2 = arith.constant 0 : index
    %1 = vector.load %arg1[%c0_1, %c0_2] : memref<128x7xf32, #tpu.memory_space<vmem>>, vector<128x7xf32>
    %cst = arith.constant dense<0.000000e+00> : vector<9x128xf32>
    %2 = tpu.matmul %0, %1, %cst {dimension_numbers = #tpu.dot_dimension_numbers<[1], [1], [0], [0], [0, 0, 1, 0], [], []>} : vector<9x7xf32>, vector<128x7xf32>, vector<9x128xf32> -> vector<9x128xf32>
    %c0_3 = arith.constant 0 : index
    %c0_4 = arith.constant 0 : index
    %3 = vector.load %arg6[%c0_3, %c0_4] : memref<9x4xf32, #tpu.memory_space<vmem>>, vector<9x4xf32>
    %cst_5 = arith.constant 0.000000e+00 : f32
    %4 = vector.broadcast %cst_5 : f32 to vector<9x128xf32>
    %5 = vector.extract_strided_slice %3 {offsets = [0, 0], sizes = [9, 1], strides = [1, 1]} : vector<9x4xf32> to vector<9x1xf32>
    %cst_6 = arith.constant 0.000000e+00 : f32
    %6 = vector.broadcast %cst_6 : f32 to vector<9x1xf32>
    %7 = arith.cmpf ogt, %5, %6 : vector<9x1xf32>
    %cst_7 = arith.constant -1.000000e+30 : f32
    %8 = vector.shape_cast %7 : vector<9x1xi1> to vector<9x1xi1>
    %9 = vector.broadcast %8 : vector<9x1xi1> to vector<9x128xi1>
    %10 = vector.broadcast %cst_7 : f32 to vector<9x128xf32>
    %11 = arith.select %9, %2, %10 : vector<9x128xi1>, vector<9x128xf32>
    %cst_8 = arith.constant dense<0xFF800000> : vector<128xf32>
    %12 = vector.multi_reduction <maximumf>, %11, %cst_8 [0] : vector<9x128xf32> to vector<128xf32>
    %13 = vector.shape_cast %12 : vector<128xf32> to vector<1x128xf32>
    %14 = vector.broadcast %5 : vector<9x1xf32> to vector<9x128xf32>
    %15 = vector.broadcast %13 : vector<1x128xf32> to vector<9x128xf32>
    %16 = arith.mulf %14, %15 : vector<9x128xf32>
    %17 = arith.addf %4, %16 : vector<9x128xf32>
    %18 = vector.extract_strided_slice %3 {offsets = [0, 1], sizes = [9, 1], strides = [1, 1]} : vector<9x4xf32> to vector<9x1xf32>
    %cst_9 = arith.constant 0.000000e+00 : f32
    %19 = vector.broadcast %cst_9 : f32 to vector<9x1xf32>
    %20 = arith.cmpf ogt, %18, %19 : vector<9x1xf32>
    %cst_10 = arith.constant -1.000000e+30 : f32
    %21 = vector.shape_cast %20 : vector<9x1xi1> to vector<9x1xi1>
    %22 = vector.broadcast %21 : vector<9x1xi1> to vector<9x128xi1>
    %23 = vector.broadcast %cst_10 : f32 to vector<9x128xf32>
    %24 = arith.select %22, %2, %23 : vector<9x128xi1>, vector<9x128xf32>
    %cst_11 = arith.constant dense<0xFF800000> : vector<128xf32>
    %25 = vector.multi_reduction <maximumf>, %24, %cst_11 [0] : vector<9x128xf32> to vector<128xf32>
    %26 = vector.shape_cast %25 : vector<128xf32> to vector<1x128xf32>
    %27 = vector.broadcast %18 : vector<9x1xf32> to vector<9x128xf32>
    %28 = vector.broadcast %26 : vector<1x128xf32> to vector<9x128xf32>
    %29 = arith.mulf %27, %28 : vector<9x128xf32>
    %30 = arith.addf %17, %29 : vector<9x128xf32>
    %31 = vector.extract_strided_slice %3 {offsets = [0, 2], sizes = [9, 1], strides = [1, 1]} : vector<9x4xf32> to vector<9x1xf32>
    %cst_12 = arith.constant 0.000000e+00 : f32
    %32 = vector.broadcast %cst_12 : f32 to vector<9x1xf32>
    %33 = arith.cmpf ogt, %31, %32 : vector<9x1xf32>
    %cst_13 = arith.constant -1.000000e+30 : f32
    %34 = vector.shape_cast %33 : vector<9x1xi1> to vector<9x1xi1>
    %35 = vector.broadcast %34 : vector<9x1xi1> to vector<9x128xi1>
    %36 = vector.broadcast %cst_13 : f32 to vector<9x128xf32>
    %37 = arith.select %35, %2, %36 : vector<9x128xi1>, vector<9x128xf32>
    %cst_14 = arith.constant dense<0xFF800000> : vector<128xf32>
    %38 = vector.multi_reduction <maximumf>, %37, %cst_14 [0] : vector<9x128xf32> to vector<128xf32>
    %39 = vector.shape_cast %38 : vector<128xf32> to vector<1x128xf32>
    %40 = vector.broadcast %31 : vector<9x1xf32> to vector<9x128xf32>
    %41 = vector.broadcast %39 : vector<1x128xf32> to vector<9x128xf32>
    %42 = arith.mulf %40, %41 : vector<9x128xf32>
    %43 = arith.addf %30, %42 : vector<9x128xf32>
    %44 = vector.extract_strided_slice %3 {offsets = [0, 3], sizes = [9, 1], strides = [1, 1]} : vector<9x4xf32> to vector<9x1xf32>
    %cst_15 = arith.constant 0.000000e+00 : f32
    %45 = vector.broadcast %cst_15 : f32 to vector<9x1xf32>
    %46 = arith.cmpf ogt, %44, %45 : vector<9x1xf32>
    %cst_16 = arith.constant -1.000000e+30 : f32
    %47 = vector.shape_cast %46 : vector<9x1xi1> to vector<9x1xi1>
    %48 = vector.broadcast %47 : vector<9x1xi1> to vector<9x128xi1>
    %49 = vector.broadcast %cst_16 : f32 to vector<9x128xf32>
    %50 = arith.select %48, %2, %49 : vector<9x128xi1>, vector<9x128xf32>
    %cst_17 = arith.constant dense<0xFF800000> : vector<128xf32>
    %51 = vector.multi_reduction <maximumf>, %50, %cst_17 [0] : vector<9x128xf32> to vector<128xf32>
    %52 = vector.shape_cast %51 : vector<128xf32> to vector<1x128xf32>
    %53 = vector.broadcast %44 : vector<9x1xf32> to vector<9x128xf32>
    %54 = vector.broadcast %52 : vector<1x128xf32> to vector<9x128xf32>
    %55 = arith.mulf %53, %54 : vector<9x128xf32>
    %56 = arith.addf %43, %55 : vector<9x128xf32>
    %57 = arith.subf %2, %56 : vector<9x128xf32>
    %58 = math.exp %57 : vector<9x128xf32>
    %c0_18 = arith.constant 0 : index
    %c0_19 = arith.constant 0 : index
    %59 = vector.load %arg4[%c0_18, %c0_19] : memref<9x9xf32, #tpu.memory_space<vmem>>, vector<9x9xf32>
    %cst_20 = arith.constant dense<0.000000e+00> : vector<9x128xf32>
    %60 = tpu.matmul %59, %58, %cst_20 {dimension_numbers = #tpu.dot_dimension_numbers<[1], [0], [0], [1], [0, 0, 1, 1], [], []>} : vector<9x9xf32>, vector<9x128xf32>, vector<9x128xf32> -> vector<9x128xf32>
    %61 = math.log %60 : vector<9x128xf32>
    %62 = arith.subf %57, %61 : vector<9x128xf32>
    %cst_21 = arith.constant -20.7232666 : f32
    %cst_22 = arith.constant -9.99999971E-10 : f32
    %63 = vector.broadcast %cst_21 : f32 to vector<9x128xf32>
    %64 = arith.maximumf %63, %62 : vector<9x128xf32>
    %65 = vector.broadcast %cst_22 : f32 to vector<9x128xf32>
    %66 = arith.minimumf %65, %64 : vector<9x128xf32>
    %67 = tpu.iota {dimensions = array<i32: 0>} : vector<6x128xi32>
    %c0_23 = arith.constant 0 : index
    %c0_24 = arith.constant 0 : index
    %68 = vector.load %arg2[%c0_23, %c0_24] : memref<1x128xi32, #tpu.memory_space<vmem>>, vector<1x128xi32>
    %69 = vector.broadcast %68 : vector<1x128xi32> to vector<6x128xi32>
    %70 = arith.cmpi eq, %67, %69 : vector<6x128xi32>
    %71 = arith.extui %70 : vector<6x128xi1> to vector<6x128xi32>
    %72 = arith.sitofp %71 : vector<6x128xi32> to vector<6x128xf32>
    %c0_25 = arith.constant 0 : index
    %c0_26 = arith.constant 0 : index
    %73 = vector.load %arg5[%c0_25, %c0_26] : memref<9x6xf32, #tpu.memory_space<vmem>>, vector<9x6xf32>
    %cst_27 = arith.constant dense<0.000000e+00> : vector<9x128xf32>
    %74 = tpu.matmul %73, %72, %cst_27 {dimension_numbers = #tpu.dot_dimension_numbers<[1], [0], [0], [1], [0, 0, 1, 1], [], []>} : vector<9x6xf32>, vector<6x128xf32>, vector<9x128xf32> -> vector<9x128xf32>
    %75 = tpu.iota {dimensions = array<i32: 1>} : vector<1x128xi32>
    %c128_i32 = arith.constant 128 : i32
    %76 = arith.muli %arg0, %c128_i32 : i32
    %77 = vector.broadcast %76 : i32 to vector<1x128xi32>
    %78 = arith.addi %77, %75 : vector<1x128xi32>
    %c8_i32 = arith.constant 8 : i32
    %79 = vector.broadcast %c8_i32 : i32 to vector<1x128xi32>
    %80 = arith.cmpi slt, %78, %79 : vector<1x128xi32>
    %81 = arith.extui %80 : vector<1x128xi1> to vector<1x128xi32>
    %82 = arith.sitofp %81 : vector<1x128xi32> to vector<1x128xf32>
    %83 = vector.broadcast %82 : vector<1x128xf32> to vector<9x128xf32>
    %84 = arith.mulf %74, %83 : vector<9x128xf32>
    %85 = arith.mulf %84, %66 : vector<9x128xf32>
    %86 = vector.shape_cast %85 : vector<9x128xf32> to vector<1x9x128xf32>
    %cst_28 = arith.constant dense<0.000000e+00> : vector<1xf32>
    %87 = vector.multi_reduction <add>, %86, %cst_28 [1, 2] : vector<1x9x128xf32> to vector<1xf32>
    %88 = vector.shape_cast %87 : vector<1xf32> to vector<1x1x1xf32>
    %89 = vector.extract %88[0, 0, 0] : f32 from vector<1x1x1xf32>
    %90 = vector.broadcast %89 : f32 to vector<1x1xf32>
    %cst_29 = arith.constant 0.000000e+00 : f32
    %91 = vector.broadcast %cst_29 : f32 to vector<1x1xf32>
    %92 = arith.subf %91, %90 : vector<1x1xf32>
    %93 = vector.shape_cast %92 : vector<1x1xf32> to vector<1x1x1xf32>
    %94 = vector.shape_cast %93 : vector<1x1x1xf32> to vector<1x1x1xf32>
    %95 = vector.broadcast %94 : vector<1x1x1xf32> to vector<1x8x128xf32>
    %c0_30 = arith.constant 0 : index
    %c0_31 = arith.constant 0 : index
    %c0_32 = arith.constant 0 : index
    %96 = vector.load %arg7[%c0_30, %c0_31, %c0_32] : memref<1x8x128xf32, #tpu.memory_space<vmem>>, vector<1x8x128xf32>
    tpu.vector_store %arg7[%c0_30, %c0_31, %c0_32], %95 {strides = array<i32>} : memref<1x8x128xf32, #tpu.memory_space<vmem>>, vector<1x8x128xf32>,
    return
  }
  func.func @transform_0(%arg0: i32) -> (i32, i32) {
    %c0_i32 = arith.constant 0 : i32
    %c0_i32_0 = arith.constant 0 : i32
    return %arg0, %c0_i32 : i32, i32
  }
  func.func @transform_1(%arg0: i32) -> (i32, i32) {
    %c0_i32 = arith.constant 0 : i32
    %c0_i32_0 = arith.constant 0 : i32
    return %c0_i32, %arg0 : i32, i32
  }
  func.func @transform_2(%arg0: i32) -> (i32, i32) {
    %c0_i32 = arith.constant 0 : i32
    %c0_i32_0 = arith.constant 0 : i32
    %c0_i32_1 = arith.constant 0 : i32
    return %c0_i32, %c0_i32_0 : i32, i32
  }
  func.func @transform_3(%arg0: i32) -> (i32, i32) {
    %c0_i32 = arith.constant 0 : i32
    %c0_i32_0 = arith.constant 0 : i32
    %c0_i32_1 = arith.constant 0 : i32
    return %c0_i32, %c0_i32_0 : i32, i32
  }
  func.func @transform_4(%arg0: i32) -> (i32, i32) {
    %c0_i32 = arith.constant 0 : i32
    %c0_i32_0 = arith.constant 0 : i32
    %c0_i32_1 = arith.constant 0 : i32
    return %c0_i32, %c0_i32_0 : i32, i32
  }
  func.func @transform_5(%arg0: i32) -> (i32, i32) {
    %c0_i32 = arith.constant 0 : i32
    %c0_i32_0 = arith.constant 0 : i32
    %c0_i32_1 = arith.constant 0 : i32
    return %c0_i32, %c0_i32_0 : i32, i32
  }
  func.func @transform_6(%arg0: i32) -> (i32, i32, i32) {
    %c0_i32 = arith.constant 0 : i32
    %c0_i32_0 = arith.constant 0 : i32
    %c0_i32_1 = arith.constant 0 : i32
    return %arg0, %c0_i32, %c0_i32_0 : i32, i32, i32
  }
}

</mosaic_0001>

<bundles_post_ra>
// kernel: tpu_custom_call.1
= control target key start
LH: loop header
LB: loop body
LE: loop exit
PB: predicated region body
PF: predicated region fallthrough
CT: control target
= control target key end

     0   :  { %vm42_vm0 = vcmask 56320   ;;  %s674_s0 = inlined_call_operand.vmem [shape: f32[128,7], index: 0, kind: input, shape index: {}]   ;;  %s675_s1 = inlined_call_operand.vmem [shape: s32[1,128], index: 1, kind: input, shape index: {}]   ;;  %s676_s2 = inlined_call_operand.vmem [shape: f32[9,7], index: 2, kind: input, shape index: {}]   ;;  %s677_s3 = inlined_call_operand.vmem [shape: f32[9,9], index: 3, kind: input, shape index: {}]   ;;  %s678_s4 = inlined_call_operand.vmem [shape: f32[9,6], index: 4, kind: input, shape index: {}]   ;;  %s679_s5 = inlined_call_operand.vmem [shape: f32[9,4], index: 5, kind: input, shape index: {}]   ;;  %s680_s6 = inlined_call_operand.hbm [shape: f32[1,8,128], index: 6, kind: output, shape index: {}]  }
   0x1   :  { %v41_v0 = vld [vmem:[%s674_s0 + $0x78] sm:$0xff]  ;;  %v40_v1 = vld [vmem:[%s674_s0 + $0x70] sm:$0xff] }
   0x2   :  { %385 = vmatpush.xpose.msk.msra.mxu0 %vm42_vm0, %v41_v0  ;;  %411 = vmatpush.xpose.msk.msra.mxu3 %vm42_vm0, %v41_v0 }
   0x3   :  { %11 = vsyncpa [#allocation3], 0  ;;  %v39_v2 = vld [vmem:[%s674_s0 + $0x68] sm:$0xff]  ;;  %v38_v3 = vld [vmem:[%s674_s0 + $0x60] sm:$0xff]  ;;  %v484_v6 = vmov 0   ;;  %v485_v10 = vmov 1   ;;  %v300_v61 = vlaneseq }
   0x4   :  { %v548_v4 = vld [vmem:[%s679_s5] sm:$0xff]  ;;  %v37_v5 = vld [vmem:[%s674_s0 + $0x58] sm:$0xff]  ;;  %437 = vset.pattern.permute.xlu1 %v484_v6  ;;  %v36_v8 = vld [vmem:[%s674_s0 + $0x50] sm:$0xff]  ;;  %435 = vset.pattern.permute.xlu0 %v485_v10  ;;  %v486_v16 = vmov 3   ;;  %v487_v17 = vmov 2   ;;  %vm136_vm11 = vcmask 1040384  }
   0x5   :  { %vm122_vm1 = vcmp.gt.f32.partialorder %v548_v4, 0.0  ;;  %v35_v9 = vld [vmem:[%s674_s0 + $0x48] sm:$0xff]  ;;  %v34_v11 = vld [vmem:[%s674_s0 + $0x40] sm:$0xff]  ;;  %v33_v13 = vld [vmem:[%s674_s0 + $0x38] sm:$0xff]  ;;  %439 = vset.pattern.permute.xlu2 %v487_v17  ;;  %vm316_vm12 = vcmask 1045504   ;;  %vm309_vm13 = vcmask 48128  }
   0x6   :  { %386 = vmatpush.xpose.msk.msra.mxu0 %vm42_vm0, %v40_v1  ;;  %412 = vmatpush.xpose.msk.msra.mxu3 %vm42_vm0, %v40_v1  ;;  %v124_v7 = vsel %vm122_vm1, 1, %v484_v6  ;;  %v121_v12 = vld [vmem:[%s679_s5 + $0x8] sm:$0x1]  ;;  %v32_v15 = vld [vmem:[%s674_s0 + $0x30] sm:$0xff]  ;;  %v30_v19 = vld [vmem:[%s674_s0 + $0x20] sm:$0xff]  ;;  %vm257_vm15 = vcmask 72704  }
   0x7   :  { %127 = vperm.xlu1 %437, %v124_v7   ;;  %vm123_vm2 = vcmp.gt.f32.partialorder %v121_v12, 0.0  ;;  %v31_v18 = vld [vmem:[%s674_s0 + $0x28] sm:$0xff]  ;;  %v29_v20 = vld [vmem:[%s674_s0 + $0x18] sm:$0xff]  ;;  %v28_v21 = vld [vmem:[%s674_s0 + $0x10] sm:$0xff]  ;;  %s376_s5 = sshll.u32 %s680_s6, 4  ;;  %s377_s5 = int_to_ptr.hbm [resolvable:$true] %s376_s5 }
   0x8   :  { %v125_v14 = vsel %vm123_vm2, 1, %v484_v6  ;;  %v27_v22 = vld [vmem:[%s674_s0 + $0x8] sm:$0xff]  ;;  %v26_v23 = vld [vmem:[%s674_s0] sm:$0xff] }
   0x9   :  { %163 = vperm.xlu0 %435, %v125_v14   ;;  %193 = vperm.xlu2 %439, %v125_v14   ;;  %v24_v24 = vld [vmem:[%s676_s2] sm:$0xff]  ;;  %v25_v25 = vld [vmem:[%s676_s2 + $0x8] sm:$0x1] }
   0xa   :  { %387 = vmatpush.xpose.msk.msra.mxu0 %vm42_vm0, %v39_v2  ;;  %413 = vmatpush.xpose.msk.msra.mxu3 %vm42_vm0, %v39_v2  ;;  %v449_v62 = vld [vmem:[%s675_s1] ss:$0 sm:$0xff] }
   0xe   :  { %388 = vmatpush.xpose.msk.msra.mxu0 %vm42_vm0, %v38_v3  ;;  %414 = vmatpush.xpose.msk.msra.mxu3 %vm42_vm0, %v38_v3 }
   0xf   :  { %438 = vset.pattern.permute.xlu1 %v485_v10 }
  0x10   :  { %160 = vperm.xlu1 %438, %v124_v7  }
  0x11   :  { %436 = vset.pattern.permute.xlu0 %v484_v6  ;;  %190 = vperm.xlu2 %439, %v124_v7  }
  0x12   :  { %389 = vmatpush.xpose.msk.msra.mxu0 %vm42_vm0, %v37_v5  ;;  %415 = vmatpush.xpose.msk.msra.mxu3 %vm42_vm0, %v37_v5  ;;  %v301_v5 = vshrl.u32 %v300_v61, 7 }
  0x13   :  { %130 = vperm.xlu0 %436, %v125_v14  }
  0x14   :  { %vm304_vm14 = vcmp.eq.s32.totalorder %v301_v5, %v449_v62 }
  0x16   :  { %390 = vmatpush.xpose.msk.msra.mxu0 %vm42_vm0, %v36_v8  ;;  %416 = vmatpush.xpose.msk.msra.mxu3 %vm42_vm0, %v36_v8 }
  0x18   :  { %440 = vset.pattern.permute.xlu1 %v486_v16 }
  0x19   :  { %223 = vperm.xlu1 %440, %v125_v14   ;;  %441 = vset.pattern.permute.xlu2 %v486_v16 }
  0x1a   :  { %391 = vmatpush.xpose.msk.msra.mxu0 %vm42_vm0, %v35_v9  ;;  %417 = vmatpush.xpose.msk.msra.mxu3 %vm42_vm0, %v35_v9 }
  0x1b   :  { %152 = vperm.xlu0 %436, %v121_v12   ;;  %220 = vperm.xlu2 %441, %v124_v7  }
  0x1e   :  { %392 = vmatpush.xpose.msk.msra.mxu0 %vm42_vm0, %v34_v11  ;;  %418 = vmatpush.xpose.msk.msra.mxu3 %vm42_vm0, %v34_v11  ;;  %v307_v11 = vld [vmem:[%s678_s4] sm:$0xff] }
  0x21   :  { %442 = vset.pattern.permute.xlu1 %v485_v10 }
  0x22   :  { %393 = vmatpush.xpose.msk.msra.mxu0 %vm42_vm0, %v33_v13  ;;  %419 = vmatpush.xpose.msk.msra.mxu3 %vm42_vm0, %v33_v13  ;;  %v488_v13 = vmov 0.0  }
  0x23   :  { %182 = vperm.xlu1 %442, %v121_v12   ;;  %445 = vset.pattern.permute.xlu0 %v487_v17  ;;  %v406_v14 = vsel %vm304_vm14, 1.0, %v488_v13 }
  0x24   :  { %208 = vperm.xlu0 %445, %v548_v4   ;;  %443 = vset.pattern.permute.xlu2 %v484_v6 }
  0x25   :  { %147 = vperm.xlu2 %443, %v548_v4   ;;  %407 = vmatpush.msk.msra.mxu2 %vm316_vm12, %v406_v14 }
  0x26   :  { %394 = vmatpush.xpose.msk.msra.mxu0 %vm42_vm0, %v32_v15  ;;  %420 = vmatpush.xpose.msk.msra.mxu3 %vm42_vm0, %v32_v15 }
  0x27   :  { %408 = vmatmul.msk.f32.vlgmr.msra.gmra.mxu2 %vm309_vm13, %v307_v11 }
  0x2a   :  { %395 = vmatpush.xpose.msk.msra.mxu0 %vm42_vm0, %v31_v18  ;;  %421 = vmatpush.xpose.msk.msra.mxu3 %vm42_vm0, %v31_v18 }
  0x2b   :  { %178 = vperm.xlu1 %442, %v548_v4  }
  0x2c   :  { %448 = vset.pattern.permute.xlu0 %v486_v16 }
  0x2d   :  { %444 = vset.pattern.permute.xlu2 %v487_v17 }
  0x2e   :  { %396 = vmatpush.xpose.msk.msra.mxu0 %vm42_vm0, %v30_v19  ;;  %422 = vmatpush.xpose.msk.msra.mxu3 %vm42_vm0, %v30_v19 }
  0x2f   :  { %212 = vperm.xlu2 %444, %v121_v12  }
  0x32   :  { %397 = vmatpush.xpose.msk.msra.mxu0 %vm42_vm0, %v29_v20  ;;  %423 = vmatpush.xpose.msk.msra.mxu3 %vm42_vm0, %v29_v20 }
  0x33   :  { %446 = vset.pattern.permute.xlu1 %v486_v16 }
  0x34   :  { %242 = vperm.xlu1 %446, %v121_v12  }
  0x36   :  { %398 = vmatpush.xpose.msk.msra.mxu0 %vm42_vm0, %v28_v21  ;;  %424 = vmatpush.xpose.msk.msra.mxu3 %vm42_vm0, %v28_v21 }
  0x37   :  { %447 = vset.pattern.permute.xlu2 %v486_v16 }
  0x38   :  { %238 = vperm.xlu2 %447, %v548_v4  }
  0x3a   :  { %399 = vmatpush.xpose.msk.msra.mxu0 %vm42_vm0, %v27_v22  ;;  %425 = vmatpush.xpose.msk.msra.mxu3 %vm42_vm0, %v27_v22 }
  0x3e   :  { %400 = vmatpush.xpose.msk.msra.mxu0 %vm42_vm0, %v26_v23  ;;  %426 = vmatpush.xpose.msk.msra.mxu3 %vm42_vm0, %v26_v23 }
  0x41   :  { %401 = vmatmul.msk.f32.vlgmr.msra.gmra.mxu0 %vm42_vm0, %v24_v24  ;;  %402 = vmatmul.msk.f32.vlgmr.msra.gmra.mxu3 %vm42_vm0, %v25_v25 }
  0x63   :  { %v194_v26 = vpop.permute.xlu2 %193 }
  0x64   :  { %vm196_vm3 = vcmp.eq.s32.totalorder %v194_v26, 1 }
  0x6b   :  { %v191_v28 = vpop.permute.xlu2 %190 }
  0x6c   :  { %vm195_vm6 = vcmp.eq.s32.totalorder %v191_v28, 1 }
  0x75   :  { %v221_v31 = vpop.permute.xlu2 %220 }
  0x76   :  { %vm225_vm4 = vcmp.eq.s32.totalorder %v221_v31, 1 }
  0x79   :  { %v128_v27 = vpop.permute.xlu1 %127 }
  0x7a   :  { %vm132_vm5 = vcmp.eq.s32.totalorder %v128_v27, 1 }
  0x7b   :  { %v164_v30 = vpop.permute.xlu0 %163 }
  0x7c   :  { %vm166_vm9 = vcmp.eq.s32.totalorder %v164_v30, 1 }
  0x7f   :  { %v148_v35 = vpop.permute.xlu2 %147 }
  0x82   :  { %v161_v29 = vpop.permute.xlu1 %160 }
  0x83   :  { %vm165_vm7 = vcmp.eq.s32.totalorder %v161_v29, 1 }
  0x85   :  { %v131_v34 = vpop.permute.xlu0 %130 }
  0x86   :  { %vm133_vm8 = vcmp.eq.s32.totalorder %v131_v34, 1 }
  0x89   :  { %v213_v0 = vpop.permute.xlu2 %212 }
  0x8b   :  { %v224_v32 = vpop.permute.xlu1 %223 }
  0x8c   :  { %vm226_vm10 = vcmp.eq.s32.totalorder %v224_v32, 1 }
  0x8d   :  { %v153_v63 = vpop.permute.xlu0 %152 }
  0x92   :  { %v239_v28 = vpop.permute.xlu2 %238 }
  0x95   :  { %v183_v40 = vpop.permute.xlu1 %182 }
  0x96   :  { %v209_v22 = vpop.permute.xlu0 %208 }
  0x9d   :  { %v179_v6 = vpop.permute.xlu1 %178 }
  0xa6   :  { %v243_v29 = vpop.permute.xlu1 %242 }
  0xbe   :  { %v631_v33 = vpop.f32.mrf.mxu0 }
  0xbf   :  { %v134_v36 = vsel %vm132_vm5, %v631_v33, -1e+30  ;;  %v167_v37 = vsel %vm165_vm7, %v631_v33, -1e+30  ;;  %v197_v38 = vsel %vm195_vm6, %v631_v33, -1e+30 }
  0xc0   :  { %v227_v39 = vsel %vm225_vm4, %v631_v33, -1e+30 }
  0xc4   :  { %v637_v41 = vpop.f32.mrf.mxu3 }
  0xc5   :  { %v135_v42 = vsel %vm133_vm8, %v637_v41, -1e+30  ;;  %v168_v43 = vsel %vm166_vm9, %v637_v41, -1e+30  ;;  %v198_v44 = vsel %vm196_vm3, %v637_v41, -1e+30 }
  0xc6   :  { %v137_v45 = vsel %vm136_vm11, %v135_v42, -inf  ;;  %v169_v46 = vsel %vm136_vm11, %v168_v43, -inf  ;;  %v199_v47 = vsel %vm136_vm11, %v198_v44, -inf  ;;  %v228_v48 = vsel %vm226_vm10, %v637_v41, -1e+30 }
  0xc7   :  { %v138_v49 = vmax.f32 %v134_v36, %v137_v45  ;;  %v170_v50 = vmax.f32 %v167_v37, %v169_v46  ;;  %v200_v51 = vmax.f32 %v197_v38, %v199_v47  ;;  %v229_v52 = vsel %vm136_vm11, %v228_v48, -inf  ;;  %v308_v36 = vld [vmem:[%s678_s4 + $0x8] sm:$0x1]  ;;  %v255_v48 = vld [vmem:[%s677_s3] sm:$0xff] }
  0xc8   :  { %v230_v53 = vmax.f32 %v227_v39, %v229_v52  ;;  %409 = vmatmul.msk.f32.gmra.mxu2 %vm309_vm13, %v308_v36 }
  0xc9   :  { %v139_v54 = vrot.slane %v138_v49, 4  ;;  %v171_v55 = vrot.slane %v170_v50, 4  ;;  %v201_v56 = vrot.slane %v200_v51, 4 }
  0xca   :  { %v231_v57 = vrot.slane %v230_v53, 4 }
  0xcb   :  { %v140_v58 = vmax.f32 %v138_v49, %v139_v54  ;;  %v172_v59 = vmax.f32 %v170_v50, %v171_v55  ;;  %v202_v60 = vmax.f32 %v200_v51, %v201_v56  ;;  %v337_v51 = vpop.f32.mrf.mxu2  ;;  %v344_v54 = vand.u32 127, %v300_v61 }
  0xcc   :  { %v232_v1 = vmax.f32 %v230_v53, %v231_v57 }
  0xcd   :  { %v141_v2 = vrot.slane %v140_v58, 2  ;;  %v173_v3 = vrot.slane %v172_v59, 2  ;;  %v203_v4 = vrot.slane %v202_v60, 2  ;;  %vm348_vm0 = vcmp.lt.s32.totalorder %v344_v54, 8 }
  0xce   :  { %v233_v7 = vrot.slane %v232_v1, 2  ;;  %v410_v62 = vsel %vm348_vm0, 1.0, %v488_v13 }
  0xcf   :  { %v142_v8 = vmax.f32 %v140_v58, %v141_v2  ;;  %v174_v9 = vmax.f32 %v172_v59, %v173_v3  ;;  %v204_v10 = vmax.f32 %v202_v60, %v203_v4  ;;  %v351_v2 = vmul.f32 %v410_v62, %v337_v51 }
  0xd0   :  { %v234_v12 = vmax.f32 %v232_v1, %v233_v7 }
  0xd1   :  { %v143_v15 = vrot.slane %v142_v8, 1  ;;  %v175_v16 = vrot.slane %v174_v9, 1  ;;  %v205_v17 = vrot.slane %v204_v10, 1 }
  0xd2   :  { %v235_v18 = vrot.slane %v234_v12, 1 }
  0xd3   :  { %v144_v19 = vmax.f32 %v142_v8, %v143_v15  ;;  %v176_v20 = vmax.f32 %v174_v9, %v175_v16  ;;  %v206_v21 = vmax.f32 %v204_v10, %v205_v17 }
  0xd4   :  { %v236_v23 = vmax.f32 %v234_v12, %v235_v18 }
  0xd5   :  { %v155_v24 = vmul.f32 %v148_v35, %v144_v19  ;;  %v185_v25 = vmul.f32 %v179_v6, %v176_v20  ;;  %v186_v26 = vmul.f32 %v183_v40, %v176_v20  ;;  %v156_v27 = vmul.f32 %v153_v63, %v144_v19 }
  0xd6   :  { %v216_v32 = vmul.f32 %v213_v0, %v206_v21  ;;  %v215_v34 = vmul.f32 %v209_v22, %v206_v21  ;;  %v245_v39 = vmul.f32 %v239_v28, %v236_v23  ;;  %v246_v42 = vmul.f32 %v243_v29, %v236_v23 }
  0xd7   :  { %v187_v30 = vadd.f32 %v185_v25, %v155_v24  ;;  %v188_v31 = vadd.f32 %v186_v26, %v156_v27 }
  0xd9   :  { %v218_v37 = vadd.f32 %v216_v32, %v188_v31  ;;  %v217_v38 = vadd.f32 %v215_v34, %v187_v30 }
  0xdb   :  { %v247_v35 = vadd.f32 %v245_v39, %v217_v38  ;;  %v248_v43 = vadd.f32 %v246_v42, %v218_v37 }
  0xdd   :  { %v249_v40 = vsub.f32 %v631_v33, %v247_v35  ;;  %v250_v44 = vsub.f32 %v637_v41, %v248_v43  ;;  %v256_v33 = vld [vmem:[%s677_s3 + $0x8] sm:$0x1]  ;;  %s489_s3 = smov [#allocation2]  }
  0xde   :  { %s374_s18 = sshll.u32 %s489_s3, 4  ;;  %s375_s18 = int_to_ptr.vmem [resolvable:$true] %s374_s18 }
  0xdf   :  { %v251_v45 = vmul.f32 1.442695, %v249_v40  ;;  %v253_v46 = vmul.f32 1.442695, %v250_v44 }
  0xe1   :  { %450 = vpow2.f32 %v253_v46 }
  0xe2   :  { %452 = vpow2.f32 %v251_v45 }
  0xe7   :  { %v451_v47 = vpop.eup %450 }
  0xe8   :  { %403 = vmatpush.msk.msra.mxu1 %vm136_vm11, %v451_v47  ;;  %v453_v49 = vpop.eup %452 }
  0xea   :  { %282 = vmatpush.msra.mxu1 %v453_v49 }
  0xeb   :  { %404 = vmatmul.msk.f32.vlgmr.msra.gmra.mxu1 %vm257_vm15, %v255_v48 }
  0xf3   :  { %405 = vmatmul.msk.f32.gmra.mxu1 %vm257_vm15, %v256_v33 }
 0x14b   :  { %v340_v59 = vpop.f32.mrf.mxu2 }
 0x14c   :  { %v352_v0 = vmul.f32 %v410_v62, %v340_v59 }
 0x168   :  { %v284_v41 = vpop.f32.mrf.mxu1 }
 0x169   :  { %454 = vlog2.f32 %v284_v41 }
 0x16f   :  { %v455_v50 = vpop.eup %454 }
 0x170   :  { %v287_v52 = vpop.f32.mrf.mxu1  ;;  %v291_v53 = vmul.f32 0.6931472, %v455_v50 }
 0x171   :  { %456 = vlog2.f32 %v287_v52 }
 0x172   :  { %v294_v55 = vsub.f32 %v249_v40, %v291_v53 }
 0x174   :  { %v296_v58 = vmax.f32 %v294_v55, -20.723267 }
 0x176   :  { %v298_v1 = vmin.f32 %v296_v58, -1e-09 }
 0x177   :  { %v457_v56 = vpop.eup %456 }
 0x178   :  { %v293_v57 = vmul.f32 0.6931472, %v457_v56  ;;  %v353_v5 = vmul.f32 %v351_v2, %v298_v1 }
 0x17a   :  { %v295_v60 = vsub.f32 %v250_v44, %v293_v57 }
 0x17c   :  { %v297_v63 = vmax.f32 %v295_v60, -20.723267 }
 0x17e   :  { %v299_v3 = vmin.f32 %v297_v63, -1e-09 }
 0x180   :  { %v354_v4 = vmul.f32 %v352_v0, %v299_v3 }
 0x182   :  { %v355_v6 = vsel %vm136_vm11, %v354_v4, 0.0 }
 0x183   :  { %v356_v7 = vadd.f32 %v355_v6, %v353_v5 }
 0x185   :  { %357 = vadd.xlane.f32.xlu1 %v356_v7 }
 0x1f8   :  { %v358_v61 = vpop.xlane.xlu1 %357 }
 0x1f9   :  { %v359_v8 = vrot.slane %v358_v61, 4 }
 0x1fb   :  { %v360_v9 = vadd.f32 %v359_v8, %v358_v61 }
 0x1fd   :  { %v361_v10 = vrot.slane %v360_v9, 2 }
 0x1ff   :  { %v362_v11 = vadd.f32 %v361_v10, %v360_v9 }
 0x201   :  { %v363_v12 = vrot.slane %v362_v11, 1 }
 0x203   :  { %v364_v14 = vadd.f32 %v363_v12, %v362_v11 }
 0x205   :  { %427 = vpush %v364_v14 }
 0x236   :  { %s428_s21 = spop %427 }
 0x237   :  { %v366_v13 = vstv %s428_s21 }
 0x238   :  { %v367_v15 = vsub.f32 0.0, %v366_v13 }
 0x23a   :  { %368 = vst [vmem:[#allocation2] sm:$0xff] %v367_v15 }
 0x23b   :  { %379 = dma.vmem_to_hbm [thread:$0]  %s375_s18, 128, %s377_s5, [#allocation3]  }
 0x23c   :  { %482 = dma.done.wait [#allocation3], 128  }
 0x23d   :  { %483 = vsyncadd [#allocation3], 4294967168 }
 0x23e   :  { %384 = vsyncpa [#allocation3], 1 }

</bundles_post_ra>
